<compile_context>
chip_gen: v6e
topology: v6e:2x2x1
jax: 0.10.0
libtpu: 0.0.40
codegen_flags: <defaults>
</compile_context>

<pallas_src>
import jax
import jax.numpy as jnp
from jax import lax
from jax.experimental import pallas as pl
from jax.experimental.pallas import tpu as pltpu


def _aspp_kernel(p_ref, w_ref, o_ref):
    # p_ref: (KKC+1, HW)   im2col patches (+ ones row) for one batch element
    # w_ref: (TCO, KKC+1)  weight tile with bias folded into the last column
    # o_ref: (TCO, HW)     output tile, lane-dense along HW
    acc = jnp.dot(w_ref[...], p_ref[...],
                  preferred_element_type=jnp.float32)       # single MXU matmul (bias included)
    o_ref[...] = jnp.maximum(acc, 0.0).astype(o_ref.dtype)  # ReLU + store


def aspp_forward(x_nchw, weight, bias, *, padding, dilation):
    """x_nchw: (N, Cin, H, W); weight: (Cout, Cin, K, K); bias: (Cout,)."""
    N, Cin, H, W = x_nchw.shape
    Cout, _, K, _ = weight.shape

    Hp, Wp = H + 2 * padding, W + 2 * padding
    H_out = Hp - dilation * (K - 1)
    W_out = Wp - dilation * (K - 1)
    HW = H_out * W_out
    KKC = K * K * Cin
    KKC1 = KKC + 1  # + ones row for the folded bias

    # ---- wrapper glue: im2col (stay in NCHW; spatial dim ends up on lanes) ----
    x_pad = jnp.pad(x_nchw, ((0, 0), (0, 0), (padding, padding), (padding, padding)))
    taps = []
    for kh in range(K):
        for kw in range(K):
            h0, w0 = kh * dilation, kw * dilation
            taps.append(x_pad[:, :, h0:h0 + H_out, w0:w0 + W_out])   # (N, Cin, Ho, Wo)
    patches = jnp.concatenate(taps, axis=1).reshape(N, KKC, HW)      # (N, K*K*Cin, HW)
    ones_row = jnp.ones((N, 1, HW), dtype=patches.dtype)
    patches = jnp.concatenate([patches, ones_row], axis=1)           # (N, KKC+1, HW)

    # weights: OIHW -> (Cout, kh, kw, cin) -> (Cout, K*K*Cin), matching patch
    # ordering, then append the bias as the last contraction column.
    w_flat = jnp.transpose(weight, (0, 2, 3, 1)).reshape(Cout, KKC)
    w_aug = jnp.concatenate(
        [w_flat, bias.reshape(Cout, 1).astype(w_flat.dtype)], axis=1)  # (Cout, KKC+1)

    # Grid collapse: weights resident, >= 2 parallel steps total.
    #   N >= 2 : one Cout tile (grid = (N, 1)), batch axis feeds both v7x TCs.
    #   N == 1 : split Cout into exactly 2 tiles so the dual-TC chip still has
    #            two parallel steps.  (On v5e/v6e 1-2 steps is strictly best.)
    if N >= 2 or Cout % 2 != 0:
        TCO = Cout
    else:
        TCO = Cout // 2
    n_co = Cout // TCO

    cost = pl.CostEstimate(
        flops=2 * N * Cout * KKC1 * HW,
        transcendentals=0,
        bytes_accessed=4 * (patches.size + w_aug.size + N * Cout * HW),
    )

    out_flat = pl.pallas_call(
        _aspp_kernel,
        out_shape=jax.ShapeDtypeStruct((N, Cout, HW), x_nchw.dtype),
        grid_spec=pltpu.PrefetchScalarGridSpec(
            num_scalar_prefetch=0,
            grid=(N, n_co),
            in_specs=[
                # constant across the inner Cout axis -> never re-DMA'd
                pl.BlockSpec((None, KKC1, HW), lambda n, c: (n, 0, 0)),
                # resident weights: constant block index when n_co == 1
                pl.BlockSpec((TCO, KKC1), lambda n, c: (c, 0)),
            ],
            out_specs=pl.BlockSpec((None, TCO, HW), lambda n, c: (n, c, 0)),
        ),
        compiler_params=pltpu.CompilerParams(
            dimension_semantics=("parallel", "parallel")),
        cost_estimate=cost,
    )(patches, w_aug)

    # Already NCHW element order -> free contiguous reshape (no transpose).
    return out_flat.reshape(N, Cout, H_out, W_out)


def _reference(x_nchw, weight, bias, *, padding, dilation):
    out = lax.conv_general_dilated(
        x_nchw, weight,
        window_strides=(1, 1),
        padding=((padding, padding), (padding, padding)),
        rhs_dilation=(dilation, dilation),
        dimension_numbers=("NCHW", "OIHW", "NCHW"),
    )
    out = out + bias.reshape(1, -1, 1, 1)
    return jnp.maximum(out, 0.0)


if __name__ == "__main__":
    # ASPPModule(input_size=4, kernel_size=3, padding=2, dilation=2)
    N, Cin, H, W = 2, 4, 16, 16
    Cout, K, padding, dilation = 512, 3, 2, 2

    key = jax.random.PRNGKey(0)
    kx, kw, kb = jax.random.split(key, 3)

    x = jax.random.normal(kx, (N, Cin, H, W), dtype=jnp.float32)
    # deterministic Conv2d-style init (uniform in +/- 1/sqrt(fan_in))
    fan_in = Cin * K * K
    bound = 1.0 / (fan_in ** 0.5)
    weight = jax.random.uniform(kw, (Cout, Cin, K, K), jnp.float32, -bound, bound)
    bias = jax.random.uniform(kb, (Cout,), jnp.float32, -bound, bound)

    out = aspp_forward(x, weight, bias, padding=padding, dilation=dilation)
    out = jax.block_until_ready(out)

    ref = _reference(x, weight, bias, padding=padding, dilation=dilation)
    assert out.shape == ref.shape, (out.shape, ref.shape)
    assert jnp.allclose(out, ref, atol=1e-4, rtol=1e-4), "mismatch vs reference conv"

    print("KERNEL_OK")
</pallas_src>

<mosaic_0001>
module attributes {stable_mosaic.version = 11 : i64} {
  func.func @_aspp_kernel(%arg0: i32, %arg1: i32, %arg2: memref<1x37x256xf32, #tpu.memory_space<vmem>>, %arg3: memref<512x37xf32, #tpu.memory_space<vmem>>, %arg4: memref<1x512x256xf32, #tpu.memory_space<vmem>>) attributes {dimension_semantics = [#tpu.dimension_semantics<parallel>, #tpu.dimension_semantics<parallel>], iteration_bounds = array<i64: 2, 1>, scalar_prefetch = 0 : i64, scratch_operands = 0 : i64, tpu.core_type = #tpu.core_type<tc>, window_params = [{transform_indices = @transform_0, window_bounds = array<i64: 1, 37, 256>}, {transform_indices = @transform_1, window_bounds = array<i64: 512, 37>}, {transform_indices = @transform_2, window_bounds = array<i64: 1, 512, 256>}]} {
    %c0 = arith.constant 0 : index
    %c0_0 = arith.constant 0 : index
    %0 = vector.load %arg3[%c0, %c0_0] : memref<512x37xf32, #tpu.memory_space<vmem>>, vector<512x37xf32>
    %c0_1 = arith.constant 0 : index
    %c0_2 = arith.constant 0 : index
    %c0_3 = arith.constant 0 : index
    %1 = vector.load %arg2[%c0_1, %c0_2, %c0_3] : memref<1x37x256xf32, #tpu.memory_space<vmem>>, vector<1x37x256xf32>
    %2 = vector.shape_cast %1 : vector<1x37x256xf32> to vector<37x256xf32>
    %cst = arith.constant dense<0.000000e+00> : vector<512x256xf32>
    %3 = tpu.matmul %0, %2, %cst {dimension_numbers = #tpu.dot_dimension_numbers<[1], [0], [0], [1], [0, 0, 1, 1], [], []>} : vector<512x37xf32>, vector<37x256xf32>, vector<512x256xf32> -> vector<512x256xf32>
    %cst_4 = arith.constant 0.000000e+00 : f32
    %4 = vector.broadcast %cst_4 : f32 to vector<512x256xf32>
    %5 = arith.maximumf %3, %4 : vector<512x256xf32>
    %c0_5 = arith.constant 0 : index
    %c0_6 = arith.constant 0 : index
    %c0_7 = arith.constant 0 : index
    %6 = vector.load %arg4[%c0_5, %c0_6, %c0_7] : memref<1x512x256xf32, #tpu.memory_space<vmem>>, vector<1x512x256xf32>
    %7 = vector.shape_cast %6 : vector<1x512x256xf32> to vector<512x256xf32>
    %8 = vector.shape_cast %5 : vector<512x256xf32> to vector<1x512x256xf32>
    tpu.vector_store %arg4[%c0_5, %c0_6, %c0_7], %8 {strides = array<i32>} : memref<1x512x256xf32, #tpu.memory_space<vmem>>, vector<1x512x256xf32>,
    return
  }
  func.func @transform_0(%arg0: i32, %arg1: i32) -> (i32, i32, i32) {
    %c0_i32 = arith.constant 0 : i32
    %c0_i32_0 = arith.constant 0 : i32
    %c0_i32_1 = arith.constant 0 : i32
    return %arg0, %c0_i32, %c0_i32_0 : i32, i32, i32
  }
  func.func @transform_1(%arg0: i32, %arg1: i32) -> (i32, i32) {
    %c0_i32 = arith.constant 0 : i32
    %c0_i32_0 = arith.constant 0 : i32
    return %arg1, %c0_i32 : i32, i32
  }
  func.func @transform_2(%arg0: i32, %arg1: i32) -> (i32, i32, i32) {
    %c0_i32 = arith.constant 0 : i32
    %c0_i32_0 = arith.constant 0 : i32
    return %arg0, %arg1, %c0_i32 : i32, i32, i32
  }
}

</mosaic_0001>

<bundles_post_ra>
// kernel: tpu_custom_call.1
= control target key start
LH: loop header
LB: loop body
LE: loop exit
PB: predicated region body
PF: predicated region fallthrough
CT: control target
= control target key end

     0   :  { %7 = vsyncpa [#allocation3], 0  ;;  %s2078_s0 = inlined_call_operand.vmem [shape: f32[2,37,256], index: 0, kind: input, shape index: {}]   ;;  %s2079_s1 = inlined_call_operand.vmem [shape: f32[512,37], index: 1, kind: input, shape index: {}]   ;;  %s2080_s2 = inlined_call_operand.hbm [shape: f32[2,512,256], index: 2, kind: output, shape index: {}]  }
   0x1   :  { %9 = vsyncpa [#allocation3 + $0x1], 0  ;;  %s1509_s9 = smov 0   ;;  %s1511_s10 = smov 0  }
   0x2   :  { %s1513_s11 = smov 0   ;;  %s1515_s12 = smov 0  }
   0x3   :  { %s1517_s13 = smov 0   ;;  %s1519_s14 = smov 0  }
   0x4 LB: > { %s1263_s15 = sadd.s32 4294967295, %s1488_s14   ;;  %s1264_s16 = sadd.s32 4294967294, %s1488_s14   ;;  %s1488_s14 = sphi %s1519_s14, %s15_s14   ;;  %s1484_s13 = sphi %s1517_s13, %s2087_s13   ;;  %s1480_s12 = sphi %s1515_s12, %s2086_s12   ;;  %s1476_s11 = sphi %s1513_s11, %s2085_s11   ;;  %s1472_s10 = sphi %s1511_s10, %s2084_s10   ;;  %s1468_s9 = sphi %s1509_s9, %s2083_s9  }
   0x5   : > { %s27_s17 = sadd.s32 1, %s1484_s13  ;;  %s88_s18 = sadd.s32 1, %s1476_s11 }
   0x6   : > { %p29_p0 = scmp.ge.s32.totalorder %s27_s17, 2  ;;  %p98_p1 = scmp.ne.s32.totalorder %s1476_s11, %s1472_s10 }
   0x7   : > { %p99_p2 = scmp.eq.s32.totalorder %s1263_s15, 1  ;;  %p104_p3 = scmp.ne.s32.totalorder %s1472_s10, %s1468_s9 }
   0x8   : > { %s2089_s17 = smov (%p29_p0, %s27_s17), 0  ;;  %p105_p5 = scmp.eq.s32.totalorder %s1264_s16, 1 }
   0x9   : > { %p1549_p4 = por %p99_p2, %p98_p1  ;;  %s83_s20 = ssub.s32 %s1484_s13, %s2089_s17 }
   0xa   : > { %p1268_p6 = scmp.ge.s32.totalorder %s1488_s14, 1  ;;  %p86_p7 = scmp.eq.s32.totalorder %s83_s20, 0 }
   0xb   : > { %p1556_p8 = por %p105_p5, %p104_p3  ;;  %p140_p9 = scmp.lt.s32.totalorder %s1488_s14, 3 }
   0xc   : > { %s1562_s22 = scalar_select %p86_p7, %s1476_s11, %s88_s18  }
   0xd   : > { %p141_p10 = pnand %p1268_p6, %p140_p9 }
   0xe   : > { %p167_p11 = scmp.lt.s32.totalorder (!%p141_p10), %s1480_s12, 1  ;;  %s164_s30 = sand.u32 (!%p141_p10), 1, %s1472_s10  }
   0xf   : > { %144 = sbr.rel (%p141_p10) target bundleno = 371 (0x173), region = 28  ;;  %s1269_s3 = sshll.u32 (!%p141_p10), %s164_s30, 10 }
  0x10   : > { %s1892_s4 = scalar_lea.vmem (!%p141_p10), [#allocation2], %s1269_s3  ;;  %s1342_s5 = sshll.u32 (!%p141_p10), %s1480_s12, 14 }
  0x11   : > { %s1175_s6 = sshll.u32 (!%p141_p10), %s1892_s4, 4  ;;  %s2023_s15 = scalar_lea.hbm (!%p141_p10), %s2080_s2, %s1342_s5  ;;  %s2025_s6 = int_to_ptr.vmem [resolvable:$true] %s1175_s6 }
  0x12   : > { %s1412_s16 = scalar_lea.vmem (!%p141_p10), %s2025_s6, 16384  ;;  %s1491_s18 = smov (!%p141_p10), [#allocation2]  }
  0x13   : > { %p1413_p12 = scmp.ne.s32.totalorder (!%p141_p10), %s2025_s6, %s1412_s16  ;;  %s1416_s20 = sshll.u32 (!%p141_p10), %s1491_s18, 4  ;;  %s1417_s20 = int_to_ptr.vmem [resolvable:$false] %s1416_s20 }
  0x14   : > { %v1490_v0 = vmov 0.0   ;;  %s168_s23 = scalar_select %p167_p11, %s1480_s12, 1  ;;  %vm446_vm0 = vcmask 1044480   ;;  %v179_v11 = vld [vmem:[%s2079_s1] sm:$0xff]  ;;  %vm253_vm1 = vcmask 302080   ;;  %v180_v13 = vld [vmem:[%s2079_s1 + $0x8] sm:$0xff] }
  0x15   : > { %517 = vmatprep.mubr.f32.mxu0 %v1490_v0  ;;  %709 = vmatprep.mubr.f32.mxu1 %v1490_v0  ;;  %v211_v12 = vld [vmem:[%s2079_s1 + $0x100] sm:$0xff]  ;;  %v212_v14 = vld [vmem:[%s2079_s1 + $0x108] sm:$0xff]  ;;  %v181_v15 = vld [vmem:[%s2079_s1 + $0x10] sm:$0xff]  ;;  %s2033_s12 = scalar_lea.sflag [#allocation3], %s164_s30  ;;  %p1414_p13 = pnand %p1413_p12, %p1549_p4 }
  0x16   : > { %s1353_s24 = smul.u32 80, %s168_s23  ;;  %v213_v16 = vld [vmem:[%s2079_s1 + $0x110] sm:$0xff]  ;;  %v182_v17 = vld [vmem:[%s2079_s1 + $0x18] sm:$0xff]  ;;  %v183_v19 = vld [vmem:[%s2079_s1 + $0x20] sm:$0xff]  ;;  %s1418_s23 = scalar_lea.vmem %s1417_s20, 32768 }
  0x17   : > { %v214_v18 = vld [vmem:[%s2079_s1 + $0x118] sm:$0xff]  ;;  %v215_v20 = vld [vmem:[%s2079_s1 + $0x120] sm:$0xff]  ;;  %v184_v21 = vld [vmem:[%s2079_s1 + $0x28] sm:$0xff]  ;;  %p1415_p0 = pneg %p1414_p13  ;;  %p1419_p1 = scmp.lt.s32.totalorder %s2025_s6, %s1417_s20 }
  0x18   : > { %s171_s27 = scalar_lea.vmem %s2078_s0, %s1353_s24  ;;  %v216_v22 = vld [vmem:[%s2079_s1 + $0x128] sm:$0xff]  ;;  %v185_v23 = vld [vmem:[%s2079_s1 + $0x30] sm:$0xff]  ;;  %v186_v25 = vld [vmem:[%s2079_s1 + $0x38] sm:$0xff]  ;;  %p1420_p2 = scmp.lt.s32.totalorder %s1418_s23, %s1412_s16 }
  0x19   : > { %v252_v1 = vld [vmem:[%s171_s27 + $0x48] sm:$0x1f]  ;;  %v251_v2 = vld [vmem:[%s171_s27 + $0x40] sm:$0x1f]  ;;  %v250_v3 = vld [vmem:[%s171_s27 + $0x38] sm:$0xff] }
  0x1a   : > { %1271 = vmatprep.subr.msk.mxu0 %vm446_vm0, %v252_v1  ;;  %1343 = vmatprep.subr.msk.mxu1 %vm446_vm0, %v252_v1  ;;  %v249_v4 = vld [vmem:[%s171_s27 + $0x30] sm:$0xff]  ;;  %v248_v5 = vld [vmem:[%s171_s27 + $0x28] sm:$0xff]  ;;  %v247_v6 = vld [vmem:[%s171_s27 + $0x20] sm:$0xff]  ;;  %p1421_p3 = por %p1420_p2, %p1419_p1 }
  0x1b   : > { %1272 = vmatpush1.msk.msra.mxu0 %vm446_vm0, %v251_v2  ;;  %1348 = vmatpush1.msk.msra.mxu1 %vm446_vm0, %v251_v2  ;;  %v246_v7 = vld [vmem:[%s171_s27 + $0x18] sm:$0xff]  ;;  %v245_v8 = vld [vmem:[%s171_s27 + $0x10] sm:$0xff]  ;;  %v244_v9 = vld [vmem:[%s171_s27 + $0x8] sm:$0xff] }
  0x1c   : > { %477 = vmatprep.subr.mxu0 %v250_v3  ;;  %1344 = vmatprep.subr.mxu1 %v250_v3  ;;  %v243_v10 = vld [vmem:[%s171_s27] sm:$0xff]  ;;  %v217_v24 = vld [vmem:[%s2079_s1 + $0x130] sm:$0xff]  ;;  %v218_v26 = vld [vmem:[%s2079_s1 + $0x138] sm:$0xff]  ;;  %p1422_p5 = pnand %p1421_p3, %p1415_p0 }
  0x1d   : > { %478 = vmatpush1.msra.mxu0 %v249_v4  ;;  %1349 = vmatpush1.msra.mxu1 %v249_v4  ;;  %v187_v27 = vld [vmem:[%s2079_s1 + $0x40] sm:$0xff]  ;;  %v188_v29 = vld [vmem:[%s2079_s1 + $0x48] sm:$0xff]  ;;  %v189_v31 = vld [vmem:[%s2079_s1 + $0x50] sm:$0xff] }
  0x1e   : > { %479 = vmatprep.subr.mxu0 %v248_v5  ;;  %1345 = vmatprep.subr.mxu1 %v248_v5  ;;  %v219_v28 = vld [vmem:[%s2079_s1 + $0x140] sm:$0xff]  ;;  %v220_v30 = vld [vmem:[%s2079_s1 + $0x148] sm:$0xff]  ;;  %v221_v32 = vld [vmem:[%s2079_s1 + $0x150] sm:$0xff] }
  0x1f   : > { %480 = vmatpush1.msra.mxu0 %v247_v6  ;;  %1350 = vmatpush1.msra.mxu1 %v247_v6  ;;  %v190_v33 = vld [vmem:[%s2079_s1 + $0x58] sm:$0xff]  ;;  %v191_v35 = vld [vmem:[%s2079_s1 + $0x60] sm:$0xff]  ;;  %v192_v37 = vld [vmem:[%s2079_s1 + $0x68] sm:$0xff] }
  0x20   : > { %481 = vmatprep.subr.mxu0 %v246_v7  ;;  %1346 = vmatprep.subr.mxu1 %v246_v7  ;;  %v222_v34 = vld [vmem:[%s2079_s1 + $0x158] sm:$0xff]  ;;  %v223_v36 = vld [vmem:[%s2079_s1 + $0x160] sm:$0xff]  ;;  %v224_v38 = vld [vmem:[%s2079_s1 + $0x168] sm:$0xff] }
  0x21   : > { %482 = vmatpush1.msra.mxu0 %v245_v8  ;;  %1351 = vmatpush1.msra.mxu1 %v245_v8  ;;  %v193_v39 = vld [vmem:[%s2079_s1 + $0x70] sm:$0xff]  ;;  %v194_v41 = vld [vmem:[%s2079_s1 + $0x78] sm:$0xff]  ;;  %v195_v43 = vld [vmem:[%s2079_s1 + $0x80] sm:$0xff] }
  0x22   : > { %483 = vmatprep.subr.mxu0 %v244_v9  ;;  %1347 = vmatprep.subr.mxu1 %v244_v9  ;;  %v225_v40 = vld [vmem:[%s2079_s1 + $0x170] sm:$0xff]  ;;  %v226_v42 = vld [vmem:[%s2079_s1 + $0x178] sm:$0xff]  ;;  %v227_v44 = vld [vmem:[%s2079_s1 + $0x180] sm:$0xff] }
  0x23   : > { %484 = vmatpush1.msra.mxu0 %v243_v10  ;;  %1352 = vmatpush1.msra.mxu1 %v243_v10  ;;  %v196_v45 = vld [vmem:[%s2079_s1 + $0x88] sm:$0xff]  ;;  %v197_v47 = vld [vmem:[%s2079_s1 + $0x90] sm:$0xff]  ;;  %v198_v49 = vld [vmem:[%s2079_s1 + $0x98] sm:$0xff] }
  0x24   : > { %1273 = vmatmul.mubr.msk.f32.vlgmr.msra.gmra.mxu0 %vm253_vm1, %v179_v11  ;;  %1305 = vmatmul.mubr.msk.f32.vlgmr.msra.gmra.mxu1 %vm253_vm1, %v211_v12  ;;  %v228_v46 = vld [vmem:[%s2079_s1 + $0x188] sm:$0xff]  ;;  %v229_v48 = vld [vmem:[%s2079_s1 + $0x190] sm:$0xff]  ;;  %v230_v50 = vld [vmem:[%s2079_s1 + $0x198] sm:$0xff] }
  0x25   : > { %523 = vmatprep.mubr.f32.mxu0 %v1490_v0  ;;  %715 = vmatprep.mubr.f32.mxu1 %v1490_v0  ;;  %v199_v51 = vld [vmem:[%s2079_s1 + $0xa0] sm:$0xff]  ;;  %v200_v53 = vld [vmem:[%s2079_s1 + $0xa8] sm:$0xff]  ;;  %v201_v55 = vld [vmem:[%s2079_s1 + $0xb0] sm:$0xff] }
  0x26   : > { %v231_v52 = vld [vmem:[%s2079_s1 + $0x1a0] sm:$0xff]  ;;  %v232_v54 = vld [vmem:[%s2079_s1 + $0x1a8] sm:$0xff]  ;;  %v233_v56 = vld [vmem:[%s2079_s1 + $0x1b0] sm:$0xff] }
  0x27   : > { %v202_v57 = vld [vmem:[%s2079_s1 + $0xb8] sm:$0xff]  ;;  %v203_v59 = vld [vmem:[%s2079_s1 + $0xc0] sm:$0xff]  ;;  %v204_v61 = vld [vmem:[%s2079_s1 + $0xc8] sm:$0xff] }
  0x28   : > { %1274 = vmatmul.mubr.msk.f32.gmra.mxu0 %vm253_vm1, %v180_v13  ;;  %1306 = vmatmul.mubr.msk.f32.gmra.mxu1 %vm253_vm1, %v212_v14  ;;  %v234_v58 = vld [vmem:[%s2079_s1 + $0x1b8] sm:$0xff]  ;;  %v235_v60 = vld [vmem:[%s2079_s1 + $0x1c0] sm:$0xff]  ;;  %v236_v62 = vld [vmem:[%s2079_s1 + $0x1c8] sm:$0xff] }
  0x29   : > { %529 = vmatprep.mubr.f32.mxu0 %v1490_v0  ;;  %721 = vmatprep.mubr.f32.mxu1 %v1490_v0  ;;  %v205_v63 = vld [vmem:[%s2079_s1 + $0xd0] sm:$0xff]  ;;  %v206_v2 = vld [vmem:[%s2079_s1 + $0xd8] sm:$0xff]  ;;  %v207_v4 = vld [vmem:[%s2079_s1 + $0xe0] sm:$0xff] }
  0x2a   : > { %v237_v1 = vld [vmem:[%s2079_s1 + $0x1d0] sm:$0xff]  ;;  %v238_v3 = vld [vmem:[%s2079_s1 + $0x1d8] sm:$0xff]  ;;  %v239_v5 = vld [vmem:[%s2079_s1 + $0x1e0] sm:$0xff] }
  0x2b   : > { %v208_v6 = vld [vmem:[%s2079_s1 + $0xe8] sm:$0xff]  ;;  %v209_v8 = vld [vmem:[%s2079_s1 + $0xf0] sm:$0xff]  ;;  %v210_v10 = vld [vmem:[%s2079_s1 + $0xf8] sm:$0xff] }
  0x2c   : > { %1275 = vmatmul.mubr.msk.f32.gmra.mxu0 %vm253_vm1, %v181_v15  ;;  %1307 = vmatmul.mubr.msk.f32.gmra.mxu1 %vm253_vm1, %v213_v16  ;;  %v240_v7 = vld [vmem:[%s2079_s1 + $0x1e8] sm:$0xff]  ;;  %v241_v9 = vld [vmem:[%s2079_s1 + $0x1f0] sm:$0xff]  ;;  %v242_v11 = vld [vmem:[%s2079_s1 + $0x1f8] sm:$0xff] }
  0x2d   : > { %535 = vmatprep.mubr.f32.mxu0 %v1490_v0  ;;  %727 = vmatprep.mubr.f32.mxu1 %v1490_v0 }
  0x30   : > { %1276 = vmatmul.mubr.msk.f32.gmra.mxu0 %vm253_vm1, %v182_v17  ;;  %1308 = vmatmul.mubr.msk.f32.gmra.mxu1 %vm253_vm1, %v214_v18 }
  0x31   : > { %541 = vmatprep.mubr.f32.mxu0 %v1490_v0  ;;  %733 = vmatprep.mubr.f32.mxu1 %v1490_v0 }
  0x34   : > { %1277 = vmatmul.mubr.msk.f32.gmra.mxu0 %vm253_vm1, %v183_v19  ;;  %1309 = vmatmul.mubr.msk.f32.gmra.mxu1 %vm253_vm1, %v215_v20 }
  0x35   : > { %547 = vmatprep.mubr.f32.mxu0 %v1490_v0  ;;  %739 = vmatprep.mubr.f32.mxu1 %v1490_v0 }
  0x38   : > { %1278 = vmatmul.mubr.msk.f32.gmra.mxu0 %vm253_vm1, %v184_v21  ;;  %1310 = vmatmul.mubr.msk.f32.gmra.mxu1 %vm253_vm1, %v216_v22 }
  0x39   : > { %553 = vmatprep.mubr.f32.mxu0 %v1490_v0  ;;  %745 = vmatprep.mubr.f32.mxu1 %v1490_v0 }
  0x3c   : > { %1279 = vmatmul.mubr.msk.f32.gmra.mxu0 %vm253_vm1, %v185_v23  ;;  %1311 = vmatmul.mubr.msk.f32.gmra.mxu1 %vm253_vm1, %v217_v24 }
  0x3d   : > { %559 = vmatprep.mubr.f32.mxu0 %v1490_v0  ;;  %751 = vmatprep.mubr.f32.mxu1 %v1490_v0 }
  0x40   : > { %1280 = vmatmul.mubr.msk.f32.gmra.mxu0 %vm253_vm1, %v186_v25  ;;  %1312 = vmatmul.mubr.msk.f32.gmra.mxu1 %vm253_vm1, %v218_v26 }
  0x41   : > { %565 = vmatprep.mubr.f32.mxu0 %v1490_v0  ;;  %757 = vmatprep.mubr.f32.mxu1 %v1490_v0 }
  0x44   : > { %1281 = vmatmul.mubr.msk.f32.gmra.mxu0 %vm253_vm1, %v187_v27  ;;  %1313 = vmatmul.mubr.msk.f32.gmra.mxu1 %vm253_vm1, %v219_v28 }
  0x45   : > { %571 = vmatprep.mubr.f32.mxu0 %v1490_v0  ;;  %763 = vmatprep.mubr.f32.mxu1 %v1490_v0 }
  0x48   : > { %1282 = vmatmul.mubr.msk.f32.gmra.mxu0 %vm253_vm1, %v188_v29  ;;  %1314 = vmatmul.mubr.msk.f32.gmra.mxu1 %vm253_vm1, %v220_v30 }
  0x49   : > { %577 = vmatprep.mubr.f32.mxu0 %v1490_v0  ;;  %769 = vmatprep.mubr.f32.mxu1 %v1490_v0 }
  0x4c   : > { %1283 = vmatmul.mubr.msk.f32.gmra.mxu0 %vm253_vm1, %v189_v31  ;;  %1315 = vmatmul.mubr.msk.f32.gmra.mxu1 %vm253_vm1, %v221_v32 }
  0x4d   : > { %583 = vmatprep.mubr.f32.mxu0 %v1490_v0  ;;  %775 = vmatprep.mubr.f32.mxu1 %v1490_v0 }
  0x50   : > { %1284 = vmatmul.mubr.msk.f32.gmra.mxu0 %vm253_vm1, %v190_v33  ;;  %1316 = vmatmul.mubr.msk.f32.gmra.mxu1 %vm253_vm1, %v222_v34 }
  0x51   : > { %589 = vmatprep.mubr.f32.mxu0 %v1490_v0  ;;  %781 = vmatprep.mubr.f32.mxu1 %v1490_v0 }
  0x54   : > { %1285 = vmatmul.mubr.msk.f32.gmra.mxu0 %vm253_vm1, %v191_v35  ;;  %1317 = vmatmul.mubr.msk.f32.gmra.mxu1 %vm253_vm1, %v223_v36 }
  0x55   : > { %595 = vmatprep.mubr.f32.mxu0 %v1490_v0  ;;  %787 = vmatprep.mubr.f32.mxu1 %v1490_v0 }
  0x58   : > { %1286 = vmatmul.mubr.msk.f32.gmra.mxu0 %vm253_vm1, %v192_v37  ;;  %1318 = vmatmul.mubr.msk.f32.gmra.mxu1 %vm253_vm1, %v224_v38 }
  0x59   : > { %601 = vmatprep.mubr.f32.mxu0 %v1490_v0  ;;  %793 = vmatprep.mubr.f32.mxu1 %v1490_v0 }
  0x5c   : > { %1287 = vmatmul.mubr.msk.f32.gmra.mxu0 %vm253_vm1, %v193_v39  ;;  %1319 = vmatmul.mubr.msk.f32.gmra.mxu1 %vm253_vm1, %v225_v40 }
  0x5d   : > { %607 = vmatprep.mubr.f32.mxu0 %v1490_v0  ;;  %799 = vmatprep.mubr.f32.mxu1 %v1490_v0 }
  0x60   : > { %1288 = vmatmul.mubr.msk.f32.gmra.mxu0 %vm253_vm1, %v194_v41  ;;  %1320 = vmatmul.mubr.msk.f32.gmra.mxu1 %vm253_vm1, %v226_v42 }
  0x61   : > { %613 = vmatprep.mubr.f32.mxu0 %v1490_v0  ;;  %805 = vmatprep.mubr.f32.mxu1 %v1490_v0 }
  0x64   : > { %1289 = vmatmul.mubr.msk.f32.gmra.mxu0 %vm253_vm1, %v195_v43  ;;  %1321 = vmatmul.mubr.msk.f32.gmra.mxu1 %vm253_vm1, %v227_v44 }
  0x65   : > { %619 = vmatprep.mubr.f32.mxu0 %v1490_v0  ;;  %811 = vmatprep.mubr.f32.mxu1 %v1490_v0 }
  0x68   : > { %1290 = vmatmul.mubr.msk.f32.gmra.mxu0 %vm253_vm1, %v196_v45  ;;  %1322 = vmatmul.mubr.msk.f32.gmra.mxu1 %vm253_vm1, %v228_v46 }
  0x69   : > { %625 = vmatprep.mubr.f32.mxu0 %v1490_v0  ;;  %817 = vmatprep.mubr.f32.mxu1 %v1490_v0 }
  0x6c   : > { %1291 = vmatmul.mubr.msk.f32.gmra.mxu0 %vm253_vm1, %v197_v47  ;;  %1323 = vmatmul.mubr.msk.f32.gmra.mxu1 %vm253_vm1, %v229_v48 }
  0x6d   : > { %631 = vmatprep.mubr.f32.mxu0 %v1490_v0  ;;  %823 = vmatprep.mubr.f32.mxu1 %v1490_v0 }
  0x70   : > { %1292 = vmatmul.mubr.msk.f32.gmra.mxu0 %vm253_vm1, %v198_v49  ;;  %1324 = vmatmul.mubr.msk.f32.gmra.mxu1 %vm253_vm1, %v230_v50 }
  0x71   : > { %637 = vmatprep.mubr.f32.mxu0 %v1490_v0  ;;  %829 = vmatprep.mubr.f32.mxu1 %v1490_v0 }
  0x74   : > { %1293 = vmatmul.mubr.msk.f32.gmra.mxu0 %vm253_vm1, %v199_v51  ;;  %1325 = vmatmul.mubr.msk.f32.gmra.mxu1 %vm253_vm1, %v231_v52 }
  0x75   : > { %643 = vmatprep.mubr.f32.mxu0 %v1490_v0  ;;  %835 = vmatprep.mubr.f32.mxu1 %v1490_v0 }
  0x78   : > { %1294 = vmatmul.mubr.msk.f32.gmra.mxu0 %vm253_vm1, %v200_v53  ;;  %1326 = vmatmul.mubr.msk.f32.gmra.mxu1 %vm253_vm1, %v232_v54 }
  0x79   : > { %649 = vmatprep.mubr.f32.mxu0 %v1490_v0  ;;  %841 = vmatprep.mubr.f32.mxu1 %v1490_v0 }
  0x7c   : > { %1295 = vmatmul.mubr.msk.f32.gmra.mxu0 %vm253_vm1, %v201_v55  ;;  %1327 = vmatmul.mubr.msk.f32.gmra.mxu1 %vm253_vm1, %v233_v56 }
  0x7d   : > { %655 = vmatprep.mubr.f32.mxu0 %v1490_v0  ;;  %847 = vmatprep.mubr.f32.mxu1 %v1490_v0 }
  0x80   : > { %1296 = vmatmul.mubr.msk.f32.gmra.mxu0 %vm253_vm1, %v202_v57  ;;  %1328 = vmatmul.mubr.msk.f32.gmra.mxu1 %vm253_vm1, %v234_v58 }
  0x81   : > { %661 = vmatprep.mubr.f32.mxu0 %v1490_v0  ;;  %853 = vmatprep.mubr.f32.mxu1 %v1490_v0 }
  0x84   : > { %1297 = vmatmul.mubr.msk.f32.gmra.mxu0 %vm253_vm1, %v203_v59  ;;  %1329 = vmatmul.mubr.msk.f32.gmra.mxu1 %vm253_vm1, %v235_v60 }
  0x85   : > { %667 = vmatprep.mubr.f32.mxu0 %v1490_v0  ;;  %859 = vmatprep.mubr.f32.mxu1 %v1490_v0 }
  0x88   : > { %1298 = vmatmul.mubr.msk.f32.gmra.mxu0 %vm253_vm1, %v204_v61  ;;  %1330 = vmatmul.mubr.msk.f32.gmra.mxu1 %vm253_vm1, %v236_v62 }
  0x89   : > { %673 = vmatprep.mubr.f32.mxu0 %v1490_v0  ;;  %865 = vmatprep.mubr.f32.mxu1 %v1490_v0 }
  0x8c   : > { %1299 = vmatmul.mubr.msk.f32.gmra.mxu0 %vm253_vm1, %v205_v63  ;;  %1331 = vmatmul.mubr.msk.f32.gmra.mxu1 %vm253_vm1, %v237_v1 }
  0x8d   : > { %679 = vmatprep.mubr.f32.mxu0 %v1490_v0  ;;  %871 = vmatprep.mubr.f32.mxu1 %v1490_v0 }
  0x90   : > { %1300 = vmatmul.mubr.msk.f32.gmra.mxu0 %vm253_vm1, %v206_v2  ;;  %1332 = vmatmul.mubr.msk.f32.gmra.mxu1 %vm253_vm1, %v238_v3 }
  0x91   : > { %685 = vmatprep.mubr.f32.mxu0 %v1490_v0  ;;  %877 = vmatprep.mubr.f32.mxu1 %v1490_v0 }
  0x94   : > { %1301 = vmatmul.mubr.msk.f32.gmra.mxu0 %vm253_vm1, %v207_v4  ;;  %1333 = vmatmul.mubr.msk.f32.gmra.mxu1 %vm253_vm1, %v239_v5 }
  0x95   : > { %691 = vmatprep.mubr.f32.mxu0 %v1490_v0  ;;  %883 = vmatprep.mubr.f32.mxu1 %v1490_v0 }
  0x98   : > { %1302 = vmatmul.mubr.msk.f32.gmra.mxu0 %vm253_vm1, %v208_v6  ;;  %1334 = vmatmul.mubr.msk.f32.gmra.mxu1 %vm253_vm1, %v240_v7 }
  0x99   : > { %697 = vmatprep.mubr.f32.mxu0 %v1490_v0  ;;  %889 = vmatprep.mubr.f32.mxu1 %v1490_v0 }
  0x9c   : > { %1303 = vmatmul.mubr.msk.f32.gmra.mxu0 %vm253_vm1, %v209_v8  ;;  %1335 = vmatmul.mubr.msk.f32.gmra.mxu1 %vm253_vm1, %v241_v9 }
  0x9d   : > { %703 = vmatprep.mubr.f32.mxu0 %v1490_v0  ;;  %895 = vmatprep.mubr.f32.mxu1 %v1490_v0 }
  0xa0   : > { %1304 = vmatmul.mubr.msk.f32.gmra.mxu0 %vm253_vm1, %v210_v10  ;;  %1336 = vmatmul.mubr.msk.f32.gmra.mxu1 %vm253_vm1, %v242_v11 }
  0xe4   : > { %v519_v12 = vpop.f32.mrf.mxu0  ;;  %v711_v13 = vpop.f32.mrf.mxu1 }
  0xe5   : > { %v902_v14 = vmax.f32 %v519_v12, 0.0  ;;  %v966_v15 = vmax.f32 %v711_v13, 0.0 }
  0xe6   : > { %v521_v0 = vpop.f32.mrf.mxu0  ;;  %v713_v16 = vpop.f32.mrf.mxu1 }
  0xe7   : > { %1030 = vst [vmem:[%s1892_s4] sm:$0xff] %v902_v14  ;;  %1094 = vst [vmem:[%s1892_s4 + $0x200] sm:$0xff] %v966_v15  ;;  %v903_v17 = vmax.f32 %v521_v0, 0.0  ;;  %v967_v18 = vmax.f32 %v713_v16, 0.0 }
  0xe8   : > { %v525_v19 = vpop.f32.mrf.mxu0  ;;  %v717_v20 = vpop.f32.mrf.mxu1 }
  0xe9   : > { %1031 = vst [vmem:[%s1892_s4 + $0x8] sm:$0xff] %v903_v17  ;;  %1095 = vst [vmem:[%s1892_s4 + $0x208] sm:$0xff] %v967_v18  ;;  %v904_v21 = vmax.f32 %v525_v19, 0.0  ;;  %v968_v22 = vmax.f32 %v717_v20, 0.0 }
  0xea   : > { %v527_v23 = vpop.f32.mrf.mxu0  ;;  %v719_v24 = vpop.f32.mrf.mxu1 }
  0xeb   : > { %1032 = vst [vmem:[%s1892_s4 + $0x10] sm:$0xff] %v904_v21  ;;  %1096 = vst [vmem:[%s1892_s4 + $0x210] sm:$0xff] %v968_v22  ;;  %v905_v25 = vmax.f32 %v527_v23, 0.0  ;;  %v969_v26 = vmax.f32 %v719_v24, 0.0 }
  0xec   : > { %v531_v27 = vpop.f32.mrf.mxu0  ;;  %v723_v28 = vpop.f32.mrf.mxu1 }
  0xed   : > { %1033 = vst [vmem:[%s1892_s4 + $0x18] sm:$0xff] %v905_v25  ;;  %1097 = vst [vmem:[%s1892_s4 + $0x218] sm:$0xff] %v969_v26  ;;  %v906_v29 = vmax.f32 %v531_v27, 0.0  ;;  %v970_v30 = vmax.f32 %v723_v28, 0.0 }
  0xee   : > { %v533_v31 = vpop.f32.mrf.mxu0  ;;  %v725_v32 = vpop.f32.mrf.mxu1 }
  0xef   : > { %1034 = vst [vmem:[%s1892_s4 + $0x20] sm:$0xff] %v906_v29  ;;  %1098 = vst [vmem:[%s1892_s4 + $0x220] sm:$0xff] %v970_v30  ;;  %v907_v33 = vmax.f32 %v533_v31, 0.0  ;;  %v971_v34 = vmax.f32 %v725_v32, 0.0 }
  0xf0   : > { %v537_v35 = vpop.f32.mrf.mxu0  ;;  %v729_v36 = vpop.f32.mrf.mxu1 }
  0xf1   : > { %1035 = vst [vmem:[%s1892_s4 + $0x28] sm:$0xff] %v907_v33  ;;  %1099 = vst [vmem:[%s1892_s4 + $0x228] sm:$0xff] %v971_v34  ;;  %v908_v37 = vmax.f32 %v537_v35, 0.0  ;;  %v972_v38 = vmax.f32 %v729_v36, 0.0 }
  0xf2   : > { %v539_v39 = vpop.f32.mrf.mxu0  ;;  %v731_v40 = vpop.f32.mrf.mxu1 }
  0xf3   : > { %1036 = vst [vmem:[%s1892_s4 + $0x30] sm:$0xff] %v908_v37  ;;  %1100 = vst [vmem:[%s1892_s4 + $0x230] sm:$0xff] %v972_v38  ;;  %v909_v41 = vmax.f32 %v539_v39, 0.0  ;;  %v973_v42 = vmax.f32 %v731_v40, 0.0 }
  0xf4   : > { %v543_v43 = vpop.f32.mrf.mxu0  ;;  %v735_v44 = vpop.f32.mrf.mxu1 }
  0xf5   : > { %1037 = vst [vmem:[%s1892_s4 + $0x38] sm:$0xff] %v909_v41  ;;  %1101 = vst [vmem:[%s1892_s4 + $0x238] sm:$0xff] %v973_v42  ;;  %v910_v45 = vmax.f32 %v543_v43, 0.0  ;;  %v974_v46 = vmax.f32 %v735_v44, 0.0 }
  0xf6   : > { %v545_v47 = vpop.f32.mrf.mxu0  ;;  %v737_v48 = vpop.f32.mrf.mxu1 }
  0xf7   : > { %1038 = vst [vmem:[%s1892_s4 + $0x40] sm:$0xff] %v910_v45  ;;  %1102 = vst [vmem:[%s1892_s4 + $0x240] sm:$0xff] %v974_v46  ;;  %v911_v49 = vmax.f32 %v545_v47, 0.0  ;;  %v975_v50 = vmax.f32 %v737_v48, 0.0 }
  0xf8   : > { %v549_v51 = vpop.f32.mrf.mxu0  ;;  %v741_v52 = vpop.f32.mrf.mxu1 }
  0xf9   : > { %1039 = vst [vmem:[%s1892_s4 + $0x48] sm:$0xff] %v911_v49  ;;  %1103 = vst [vmem:[%s1892_s4 + $0x248] sm:$0xff] %v975_v50  ;;  %v912_v53 = vmax.f32 %v549_v51, 0.0  ;;  %v976_v54 = vmax.f32 %v741_v52, 0.0 }
  0xfa   : > { %v551_v55 = vpop.f32.mrf.mxu0  ;;  %v743_v56 = vpop.f32.mrf.mxu1 }
  0xfb   : > { %1040 = vst [vmem:[%s1892_s4 + $0x50] sm:$0xff] %v912_v53  ;;  %1104 = vst [vmem:[%s1892_s4 + $0x250] sm:$0xff] %v976_v54  ;;  %v913_v57 = vmax.f32 %v551_v55, 0.0  ;;  %v977_v58 = vmax.f32 %v743_v56, 0.0 }
  0xfc   : > { %v555_v59 = vpop.f32.mrf.mxu0  ;;  %v747_v60 = vpop.f32.mrf.mxu1 }
  0xfd   : > { %1041 = vst [vmem:[%s1892_s4 + $0x58] sm:$0xff] %v913_v57  ;;  %1105 = vst [vmem:[%s1892_s4 + $0x258] sm:$0xff] %v977_v58  ;;  %v914_v61 = vmax.f32 %v555_v59, 0.0  ;;  %v978_v62 = vmax.f32 %v747_v60, 0.0 }
  0xfe   : > { %v557_v63 = vpop.f32.mrf.mxu0  ;;  %v749_v1 = vpop.f32.mrf.mxu1 }
  0xff   : > { %1042 = vst [vmem:[%s1892_s4 + $0x60] sm:$0xff] %v914_v61  ;;  %1106 = vst [vmem:[%s1892_s4 + $0x260] sm:$0xff] %v978_v62  ;;  %v915_v2 = vmax.f32 %v557_v63, 0.0  ;;  %v979_v3 = vmax.f32 %v749_v1, 0.0 }
 0x100   : > { %v561_v4 = vpop.f32.mrf.mxu0  ;;  %v753_v5 = vpop.f32.mrf.mxu1 }
 0x101   : > { %1043 = vst [vmem:[%s1892_s4 + $0x68] sm:$0xff] %v915_v2  ;;  %1107 = vst [vmem:[%s1892_s4 + $0x268] sm:$0xff] %v979_v3  ;;  %v916_v6 = vmax.f32 %v561_v4, 0.0  ;;  %v980_v7 = vmax.f32 %v753_v5, 0.0 }
 0x102   : > { %v563_v8 = vpop.f32.mrf.mxu0  ;;  %v755_v9 = vpop.f32.mrf.mxu1 }
 0x103   : > { %1044 = vst [vmem:[%s1892_s4 + $0x70] sm:$0xff] %v916_v6  ;;  %1108 = vst [vmem:[%s1892_s4 + $0x270] sm:$0xff] %v980_v7  ;;  %v917_v10 = vmax.f32 %v563_v8, 0.0  ;;  %v981_v11 = vmax.f32 %v755_v9, 0.0 }
 0x104   : > { %v567_v12 = vpop.f32.mrf.mxu0  ;;  %v759_v13 = vpop.f32.mrf.mxu1 }
 0x105   : > { %1045 = vst [vmem:[%s1892_s4 + $0x78] sm:$0xff] %v917_v10  ;;  %1109 = vst [vmem:[%s1892_s4 + $0x278] sm:$0xff] %v981_v11  ;;  %v918_v14 = vmax.f32 %v567_v12, 0.0  ;;  %v982_v15 = vmax.f32 %v759_v13, 0.0 }
 0x106   : > { %v569_v0 = vpop.f32.mrf.mxu0  ;;  %v761_v16 = vpop.f32.mrf.mxu1 }
 0x107   : > { %1046 = vst [vmem:[%s1892_s4 + $0x80] sm:$0xff] %v918_v14  ;;  %1110 = vst [vmem:[%s1892_s4 + $0x280] sm:$0xff] %v982_v15  ;;  %v919_v17 = vmax.f32 %v569_v0, 0.0  ;;  %v983_v18 = vmax.f32 %v761_v16, 0.0 }
 0x108   : > { %v573_v19 = vpop.f32.mrf.mxu0  ;;  %v765_v20 = vpop.f32.mrf.mxu1 }
 0x109   : > { %1047 = vst [vmem:[%s1892_s4 + $0x88] sm:$0xff] %v919_v17  ;;  %1111 = vst [vmem:[%s1892_s4 + $0x288] sm:$0xff] %v983_v18  ;;  %v920_v21 = vmax.f32 %v573_v19, 0.0  ;;  %v984_v22 = vmax.f32 %v765_v20, 0.0 }
 0x10a   : > { %v575_v23 = vpop.f32.mrf.mxu0  ;;  %v767_v24 = vpop.f32.mrf.mxu1 }
 0x10b   : > { %1048 = vst [vmem:[%s1892_s4 + $0x90] sm:$0xff] %v920_v21  ;;  %1112 = vst [vmem:[%s1892_s4 + $0x290] sm:$0xff] %v984_v22  ;;  %v921_v25 = vmax.f32 %v575_v23, 0.0  ;;  %v985_v26 = vmax.f32 %v767_v24, 0.0 }
 0x10c   : > { %v579_v27 = vpop.f32.mrf.mxu0  ;;  %v771_v28 = vpop.f32.mrf.mxu1 }
 0x10d   : > { %1049 = vst [vmem:[%s1892_s4 + $0x98] sm:$0xff] %v921_v25  ;;  %1113 = vst [vmem:[%s1892_s4 + $0x298] sm:$0xff] %v985_v26  ;;  %v922_v29 = vmax.f32 %v579_v27, 0.0  ;;  %v986_v30 = vmax.f32 %v771_v28, 0.0 }
 0x10e   : > { %v581_v31 = vpop.f32.mrf.mxu0  ;;  %v773_v32 = vpop.f32.mrf.mxu1 }
 0x10f   : > { %1050 = vst [vmem:[%s1892_s4 + $0xa0] sm:$0xff] %v922_v29  ;;  %1114 = vst [vmem:[%s1892_s4 + $0x2a0] sm:$0xff] %v986_v30  ;;  %v923_v33 = vmax.f32 %v581_v31, 0.0  ;;  %v987_v34 = vmax.f32 %v773_v32, 0.0 }
 0x110   : > { %v585_v35 = vpop.f32.mrf.mxu0  ;;  %v777_v36 = vpop.f32.mrf.mxu1 }
 0x111   : > { %1051 = vst [vmem:[%s1892_s4 + $0xa8] sm:$0xff] %v923_v33  ;;  %1115 = vst [vmem:[%s1892_s4 + $0x2a8] sm:$0xff] %v987_v34  ;;  %v924_v37 = vmax.f32 %v585_v35, 0.0  ;;  %v988_v38 = vmax.f32 %v777_v36, 0.0 }
 0x112   : > { %v587_v39 = vpop.f32.mrf.mxu0  ;;  %v779_v40 = vpop.f32.mrf.mxu1 }
 0x113   : > { %1052 = vst [vmem:[%s1892_s4 + $0xb0] sm:$0xff] %v924_v37  ;;  %1116 = vst [vmem:[%s1892_s4 + $0x2b0] sm:$0xff] %v988_v38  ;;  %v925_v41 = vmax.f32 %v587_v39, 0.0  ;;  %v989_v42 = vmax.f32 %v779_v40, 0.0 }
 0x114   : > { %v591_v43 = vpop.f32.mrf.mxu0  ;;  %v783_v44 = vpop.f32.mrf.mxu1 }
 0x115   : > { %1053 = vst [vmem:[%s1892_s4 + $0xb8] sm:$0xff] %v925_v41  ;;  %1117 = vst [vmem:[%s1892_s4 + $0x2b8] sm:$0xff] %v989_v42  ;;  %v926_v45 = vmax.f32 %v591_v43, 0.0  ;;  %v990_v46 = vmax.f32 %v783_v44, 0.0 }
 0x116   : > { %v593_v47 = vpop.f32.mrf.mxu0  ;;  %v785_v48 = vpop.f32.mrf.mxu1 }
 0x117   : > { %1054 = vst [vmem:[%s1892_s4 + $0xc0] sm:$0xff] %v926_v45  ;;  %1118 = vst [vmem:[%s1892_s4 + $0x2c0] sm:$0xff] %v990_v46  ;;  %v927_v49 = vmax.f32 %v593_v47, 0.0  ;;  %v991_v50 = vmax.f32 %v785_v48, 0.0 }
 0x118   : > { %v597_v51 = vpop.f32.mrf.mxu0  ;;  %v789_v52 = vpop.f32.mrf.mxu1 }
 0x119   : > { %1055 = vst [vmem:[%s1892_s4 + $0xc8] sm:$0xff] %v927_v49  ;;  %1119 = vst [vmem:[%s1892_s4 + $0x2c8] sm:$0xff] %v991_v50  ;;  %v928_v53 = vmax.f32 %v597_v51, 0.0  ;;  %v992_v54 = vmax.f32 %v789_v52, 0.0 }
 0x11a   : > { %v599_v55 = vpop.f32.mrf.mxu0  ;;  %v791_v56 = vpop.f32.mrf.mxu1 }
 0x11b   : > { %1056 = vst [vmem:[%s1892_s4 + $0xd0] sm:$0xff] %v928_v53  ;;  %1120 = vst [vmem:[%s1892_s4 + $0x2d0] sm:$0xff] %v992_v54  ;;  %v929_v57 = vmax.f32 %v599_v55, 0.0  ;;  %v993_v58 = vmax.f32 %v791_v56, 0.0 }
 0x11c   : > { %v603_v59 = vpop.f32.mrf.mxu0  ;;  %v795_v60 = vpop.f32.mrf.mxu1 }
 0x11d   : > { %1057 = vst [vmem:[%s1892_s4 + $0xd8] sm:$0xff] %v929_v57  ;;  %1121 = vst [vmem:[%s1892_s4 + $0x2d8] sm:$0xff] %v993_v58  ;;  %v930_v61 = vmax.f32 %v603_v59, 0.0  ;;  %v994_v62 = vmax.f32 %v795_v60, 0.0 }
 0x11e   : > { %v605_v63 = vpop.f32.mrf.mxu0  ;;  %v797_v1 = vpop.f32.mrf.mxu1 }
 0x11f   : > { %1058 = vst [vmem:[%s1892_s4 + $0xe0] sm:$0xff] %v930_v61  ;;  %1122 = vst [vmem:[%s1892_s4 + $0x2e0] sm:$0xff] %v994_v62  ;;  %v931_v2 = vmax.f32 %v605_v63, 0.0  ;;  %v995_v3 = vmax.f32 %v797_v1, 0.0 }
 0x120   : > { %v609_v4 = vpop.f32.mrf.mxu0  ;;  %v801_v5 = vpop.f32.mrf.mxu1 }
 0x121   : > { %1059 = vst [vmem:[%s1892_s4 + $0xe8] sm:$0xff] %v931_v2  ;;  %1123 = vst [vmem:[%s1892_s4 + $0x2e8] sm:$0xff] %v995_v3  ;;  %v932_v6 = vmax.f32 %v609_v4, 0.0  ;;  %v996_v7 = vmax.f32 %v801_v5, 0.0 }
 0x122   : > { %v611_v8 = vpop.f32.mrf.mxu0  ;;  %v803_v9 = vpop.f32.mrf.mxu1 }
 0x123   : > { %1060 = vst [vmem:[%s1892_s4 + $0xf0] sm:$0xff] %v932_v6  ;;  %1124 = vst [vmem:[%s1892_s4 + $0x2f0] sm:$0xff] %v996_v7  ;;  %v933_v10 = vmax.f32 %v611_v8, 0.0  ;;  %v997_v11 = vmax.f32 %v803_v9, 0.0 }
 0x124   : > { %v615_v12 = vpop.f32.mrf.mxu0  ;;  %v807_v13 = vpop.f32.mrf.mxu1 }
 0x125   : > { %1061 = vst [vmem:[%s1892_s4 + $0xf8] sm:$0xff] %v933_v10  ;;  %1125 = vst [vmem:[%s1892_s4 + $0x2f8] sm:$0xff] %v997_v11  ;;  %v934_v14 = vmax.f32 %v615_v12, 0.0  ;;  %v998_v15 = vmax.f32 %v807_v13, 0.0 }
 0x126   : > { %v617_v0 = vpop.f32.mrf.mxu0  ;;  %v809_v16 = vpop.f32.mrf.mxu1 }
 0x127   : > { %1062 = vst [vmem:[%s1892_s4 + $0x100] sm:$0xff] %v934_v14  ;;  %1126 = vst [vmem:[%s1892_s4 + $0x300] sm:$0xff] %v998_v15  ;;  %v935_v17 = vmax.f32 %v617_v0, 0.0  ;;  %v999_v18 = vmax.f32 %v809_v16, 0.0 }
 0x128   : > { %v621_v19 = vpop.f32.mrf.mxu0  ;;  %v813_v20 = vpop.f32.mrf.mxu1 }
 0x129   : > { %1063 = vst [vmem:[%s1892_s4 + $0x108] sm:$0xff] %v935_v17  ;;  %1127 = vst [vmem:[%s1892_s4 + $0x308] sm:$0xff] %v999_v18  ;;  %v936_v21 = vmax.f32 %v621_v19, 0.0  ;;  %v1000_v22 = vmax.f32 %v813_v20, 0.0 }
 0x12a   : > { %v623_v23 = vpop.f32.mrf.mxu0  ;;  %v815_v24 = vpop.f32.mrf.mxu1 }
 0x12b   : > { %1064 = vst [vmem:[%s1892_s4 + $0x110] sm:$0xff] %v936_v21  ;;  %1128 = vst [vmem:[%s1892_s4 + $0x310] sm:$0xff] %v1000_v22  ;;  %v937_v25 = vmax.f32 %v623_v23, 0.0  ;;  %v1001_v26 = vmax.f32 %v815_v24, 0.0 }
 0x12c   : > { %v627_v27 = vpop.f32.mrf.mxu0  ;;  %v819_v28 = vpop.f32.mrf.mxu1 }
 0x12d   : > { %1065 = vst [vmem:[%s1892_s4 + $0x118] sm:$0xff] %v937_v25  ;;  %1129 = vst [vmem:[%s1892_s4 + $0x318] sm:$0xff] %v1001_v26  ;;  %v938_v29 = vmax.f32 %v627_v27, 0.0  ;;  %v1002_v30 = vmax.f32 %v819_v28, 0.0 }
 0x12e   : > { %v629_v31 = vpop.f32.mrf.mxu0  ;;  %v821_v32 = vpop.f32.mrf.mxu1 }
 0x12f   : > { %1066 = vst [vmem:[%s1892_s4 + $0x120] sm:$0xff] %v938_v29  ;;  %1130 = vst [vmem:[%s1892_s4 + $0x320] sm:$0xff] %v1002_v30  ;;  %v939_v33 = vmax.f32 %v629_v31, 0.0  ;;  %v1003_v34 = vmax.f32 %v821_v32, 0.0 }
 0x130   : > { %v633_v35 = vpop.f32.mrf.mxu0  ;;  %v825_v36 = vpop.f32.mrf.mxu1 }
 0x131   : > { %1067 = vst [vmem:[%s1892_s4 + $0x128] sm:$0xff] %v939_v33  ;;  %1131 = vst [vmem:[%s1892_s4 + $0x328] sm:$0xff] %v1003_v34  ;;  %v940_v37 = vmax.f32 %v633_v35, 0.0  ;;  %v1004_v38 = vmax.f32 %v825_v36, 0.0 }
 0x132   : > { %v635_v39 = vpop.f32.mrf.mxu0  ;;  %v827_v40 = vpop.f32.mrf.mxu1 }
 0x133   : > { %1068 = vst [vmem:[%s1892_s4 + $0x130] sm:$0xff] %v940_v37  ;;  %1132 = vst [vmem:[%s1892_s4 + $0x330] sm:$0xff] %v1004_v38  ;;  %v941_v41 = vmax.f32 %v635_v39, 0.0  ;;  %v1005_v42 = vmax.f32 %v827_v40, 0.0 }
 0x134   : > { %v639_v43 = vpop.f32.mrf.mxu0  ;;  %v831_v44 = vpop.f32.mrf.mxu1 }
 0x135   : > { %1069 = vst [vmem:[%s1892_s4 + $0x138] sm:$0xff] %v941_v41  ;;  %1133 = vst [vmem:[%s1892_s4 + $0x338] sm:$0xff] %v1005_v42  ;;  %v942_v45 = vmax.f32 %v639_v43, 0.0  ;;  %v1006_v46 = vmax.f32 %v831_v44, 0.0 }
 0x136   : > { %v641_v47 = vpop.f32.mrf.mxu0  ;;  %v833_v48 = vpop.f32.mrf.mxu1 }
 0x137   : > { %1070 = vst [vmem:[%s1892_s4 + $0x140] sm:$0xff] %v942_v45  ;;  %1134 = vst [vmem:[%s1892_s4 + $0x340] sm:$0xff] %v1006_v46  ;;  %v943_v49 = vmax.f32 %v641_v47, 0.0  ;;  %v1007_v50 = vmax.f32 %v833_v48, 0.0 }
 0x138   : > { %v645_v51 = vpop.f32.mrf.mxu0  ;;  %v837_v52 = vpop.f32.mrf.mxu1 }
 0x139   : > { %1071 = vst [vmem:[%s1892_s4 + $0x148] sm:$0xff] %v943_v49  ;;  %1135 = vst [vmem:[%s1892_s4 + $0x348] sm:$0xff] %v1007_v50  ;;  %v944_v53 = vmax.f32 %v645_v51, 0.0  ;;  %v1008_v54 = vmax.f32 %v837_v52, 0.0 }
 0x13a   : > { %v647_v55 = vpop.f32.mrf.mxu0  ;;  %v839_v56 = vpop.f32.mrf.mxu1 }
 0x13b   : > { %1072 = vst [vmem:[%s1892_s4 + $0x150] sm:$0xff] %v944_v53  ;;  %1136 = vst [vmem:[%s1892_s4 + $0x350] sm:$0xff] %v1008_v54  ;;  %v945_v57 = vmax.f32 %v647_v55, 0.0  ;;  %v1009_v58 = vmax.f32 %v839_v56, 0.0 }
 0x13c   : > { %v651_v59 = vpop.f32.mrf.mxu0  ;;  %v843_v60 = vpop.f32.mrf.mxu1 }
 0x13d   : > { %1073 = vst [vmem:[%s1892_s4 + $0x158] sm:$0xff] %v945_v57  ;;  %1137 = vst [vmem:[%s1892_s4 + $0x358] sm:$0xff] %v1009_v58  ;;  %v946_v61 = vmax.f32 %v651_v59, 0.0  ;;  %v1010_v62 = vmax.f32 %v843_v60, 0.0 }
 0x13e   : > { %v653_v63 = vpop.f32.mrf.mxu0  ;;  %v845_v1 = vpop.f32.mrf.mxu1 }
 0x13f   : > { %1074 = vst [vmem:[%s1892_s4 + $0x160] sm:$0xff] %v946_v61  ;;  %1138 = vst [vmem:[%s1892_s4 + $0x360] sm:$0xff] %v1010_v62  ;;  %v947_v2 = vmax.f32 %v653_v63, 0.0  ;;  %v1011_v3 = vmax.f32 %v845_v1, 0.0 }
 0x140   : > { %v657_v4 = vpop.f32.mrf.mxu0  ;;  %v849_v5 = vpop.f32.mrf.mxu1 }
 0x141   : > { %1075 = vst [vmem:[%s1892_s4 + $0x168] sm:$0xff] %v947_v2  ;;  %1139 = vst [vmem:[%s1892_s4 + $0x368] sm:$0xff] %v1011_v3  ;;  %v948_v6 = vmax.f32 %v657_v4, 0.0  ;;  %v1012_v7 = vmax.f32 %v849_v5, 0.0 }
 0x142   : > { %v659_v8 = vpop.f32.mrf.mxu0  ;;  %v851_v9 = vpop.f32.mrf.mxu1 }
 0x143   : > { %1076 = vst [vmem:[%s1892_s4 + $0x170] sm:$0xff] %v948_v6  ;;  %1140 = vst [vmem:[%s1892_s4 + $0x370] sm:$0xff] %v1012_v7  ;;  %v949_v10 = vmax.f32 %v659_v8, 0.0  ;;  %v1013_v11 = vmax.f32 %v851_v9, 0.0 }
 0x144   : > { %v663_v12 = vpop.f32.mrf.mxu0  ;;  %v855_v13 = vpop.f32.mrf.mxu1 }
 0x145   : > { %1077 = vst [vmem:[%s1892_s4 + $0x178] sm:$0xff] %v949_v10  ;;  %1141 = vst [vmem:[%s1892_s4 + $0x378] sm:$0xff] %v1013_v11  ;;  %v950_v14 = vmax.f32 %v663_v12, 0.0  ;;  %v1014_v15 = vmax.f32 %v855_v13, 0.0 }
 0x146   : > { %v665_v0 = vpop.f32.mrf.mxu0  ;;  %v857_v16 = vpop.f32.mrf.mxu1 }
 0x147   : > { %1078 = vst [vmem:[%s1892_s4 + $0x180] sm:$0xff] %v950_v14  ;;  %1142 = vst [vmem:[%s1892_s4 + $0x380] sm:$0xff] %v1014_v15  ;;  %v951_v17 = vmax.f32 %v665_v0, 0.0  ;;  %v1015_v18 = vmax.f32 %v857_v16, 0.0 }
 0x148   : > { %v669_v19 = vpop.f32.mrf.mxu0  ;;  %v861_v20 = vpop.f32.mrf.mxu1 }
 0x149   : > { %1079 = vst [vmem:[%s1892_s4 + $0x188] sm:$0xff] %v951_v17  ;;  %1143 = vst [vmem:[%s1892_s4 + $0x388] sm:$0xff] %v1015_v18  ;;  %v952_v21 = vmax.f32 %v669_v19, 0.0  ;;  %v1016_v22 = vmax.f32 %v861_v20, 0.0 }
 0x14a   : > { %v671_v23 = vpop.f32.mrf.mxu0  ;;  %v863_v24 = vpop.f32.mrf.mxu1 }
 0x14b   : > { %1080 = vst [vmem:[%s1892_s4 + $0x190] sm:$0xff] %v952_v21  ;;  %1144 = vst [vmem:[%s1892_s4 + $0x390] sm:$0xff] %v1016_v22  ;;  %v953_v25 = vmax.f32 %v671_v23, 0.0  ;;  %v1017_v26 = vmax.f32 %v863_v24, 0.0 }
 0x14c   : > { %v675_v27 = vpop.f32.mrf.mxu0  ;;  %v867_v28 = vpop.f32.mrf.mxu1 }
 0x14d   : > { %1081 = vst [vmem:[%s1892_s4 + $0x198] sm:$0xff] %v953_v25  ;;  %1145 = vst [vmem:[%s1892_s4 + $0x398] sm:$0xff] %v1017_v26  ;;  %v954_v29 = vmax.f32 %v675_v27, 0.0  ;;  %v1018_v30 = vmax.f32 %v867_v28, 0.0 }
 0x14e   : > { %v677_v31 = vpop.f32.mrf.mxu0  ;;  %v869_v32 = vpop.f32.mrf.mxu1 }
 0x14f   : > { %1082 = vst [vmem:[%s1892_s4 + $0x1a0] sm:$0xff] %v954_v29  ;;  %1146 = vst [vmem:[%s1892_s4 + $0x3a0] sm:$0xff] %v1018_v30  ;;  %v955_v33 = vmax.f32 %v677_v31, 0.0  ;;  %v1019_v34 = vmax.f32 %v869_v32, 0.0 }
 0x150   : > { %v681_v35 = vpop.f32.mrf.mxu0  ;;  %v873_v36 = vpop.f32.mrf.mxu1 }
 0x151   : > { %1083 = vst [vmem:[%s1892_s4 + $0x1a8] sm:$0xff] %v955_v33  ;;  %1147 = vst [vmem:[%s1892_s4 + $0x3a8] sm:$0xff] %v1019_v34  ;;  %v956_v37 = vmax.f32 %v681_v35, 0.0  ;;  %v1020_v38 = vmax.f32 %v873_v36, 0.0 }
 0x152   : > { %v683_v39 = vpop.f32.mrf.mxu0  ;;  %v875_v40 = vpop.f32.mrf.mxu1 }
 0x153   : > { %1084 = vst [vmem:[%s1892_s4 + $0x1b0] sm:$0xff] %v956_v37  ;;  %1148 = vst [vmem:[%s1892_s4 + $0x3b0] sm:$0xff] %v1020_v38  ;;  %v957_v41 = vmax.f32 %v683_v39, 0.0  ;;  %v1021_v42 = vmax.f32 %v875_v40, 0.0 }
 0x154   : > { %v687_v43 = vpop.f32.mrf.mxu0  ;;  %v879_v44 = vpop.f32.mrf.mxu1 }
 0x155   : > { %1085 = vst [vmem:[%s1892_s4 + $0x1b8] sm:$0xff] %v957_v41  ;;  %1149 = vst [vmem:[%s1892_s4 + $0x3b8] sm:$0xff] %v1021_v42  ;;  %v958_v45 = vmax.f32 %v687_v43, 0.0  ;;  %v1022_v46 = vmax.f32 %v879_v44, 0.0 }
 0x156   : > { %v689_v47 = vpop.f32.mrf.mxu0  ;;  %v881_v48 = vpop.f32.mrf.mxu1 }
 0x157   : > { %1086 = vst [vmem:[%s1892_s4 + $0x1c0] sm:$0xff] %v958_v45  ;;  %1150 = vst [vmem:[%s1892_s4 + $0x3c0] sm:$0xff] %v1022_v46  ;;  %v959_v49 = vmax.f32 %v689_v47, 0.0  ;;  %v1023_v50 = vmax.f32 %v881_v48, 0.0 }
 0x158   : > { %v693_v51 = vpop.f32.mrf.mxu0  ;;  %v885_v52 = vpop.f32.mrf.mxu1 }
 0x159   : > { %1087 = vst [vmem:[%s1892_s4 + $0x1c8] sm:$0xff] %v959_v49  ;;  %1151 = vst [vmem:[%s1892_s4 + $0x3c8] sm:$0xff] %v1023_v50  ;;  %v960_v53 = vmax.f32 %v693_v51, 0.0  ;;  %v1024_v54 = vmax.f32 %v885_v52, 0.0 }
 0x15a   : > { %v695_v55 = vpop.f32.mrf.mxu0  ;;  %v887_v56 = vpop.f32.mrf.mxu1 }
 0x15b   : > { %1088 = vst [vmem:[%s1892_s4 + $0x1d0] sm:$0xff] %v960_v53  ;;  %1152 = vst [vmem:[%s1892_s4 + $0x3d0] sm:$0xff] %v1024_v54  ;;  %v961_v57 = vmax.f32 %v695_v55, 0.0  ;;  %v1025_v58 = vmax.f32 %v887_v56, 0.0 }
 0x15c   : > { %v699_v59 = vpop.f32.mrf.mxu0  ;;  %v891_v60 = vpop.f32.mrf.mxu1 }
 0x15d   : > { %1089 = vst [vmem:[%s1892_s4 + $0x1d8] sm:$0xff] %v961_v57  ;;  %1153 = vst [vmem:[%s1892_s4 + $0x3d8] sm:$0xff] %v1025_v58  ;;  %v962_v61 = vmax.f32 %v699_v59, 0.0  ;;  %v1026_v62 = vmax.f32 %v891_v60, 0.0 }
 0x15e   : > { %v701_v63 = vpop.f32.mrf.mxu0  ;;  %v893_v1 = vpop.f32.mrf.mxu1 }
 0x15f   : > { %1090 = vst [vmem:[%s1892_s4 + $0x1e0] sm:$0xff] %v962_v61  ;;  %1154 = vst [vmem:[%s1892_s4 + $0x3e0] sm:$0xff] %v1026_v62  ;;  %v963_v2 = vmax.f32 %v701_v63, 0.0  ;;  %v1027_v3 = vmax.f32 %v893_v1, 0.0 }
 0x160   : > { %v705_v4 = vpop.f32.mrf.mxu0  ;;  %v897_v5 = vpop.f32.mrf.mxu1 }
 0x161   : > { %1091 = vst [vmem:[%s1892_s4 + $0x1e8] sm:$0xff] %v963_v2  ;;  %1155 = vst [vmem:[%s1892_s4 + $0x3e8] sm:$0xff] %v1027_v3  ;;  %v964_v6 = vmax.f32 %v705_v4, 0.0  ;;  %v1028_v7 = vmax.f32 %v897_v5, 0.0 }
 0x162   : > { %v707_v8 = vpop.f32.mrf.mxu0  ;;  %v899_v9 = vpop.f32.mrf.mxu1 }
 0x163   : > { %1092 = vst [vmem:[%s1892_s4 + $0x1f0] sm:$0xff] %v964_v6  ;;  %1156 = vst [vmem:[%s1892_s4 + $0x3f0] sm:$0xff] %v1028_v7  ;;  %v965_v10 = vmax.f32 %v707_v8, 0.0  ;;  %v1029_v11 = vmax.f32 %v899_v9, 0.0 }
 0x165   : > { %1093 = vst [vmem:[%s1892_s4 + $0x1f8] sm:$0xff] %v965_v10  ;;  %1157 = vst [vmem:[%s1892_s4 + $0x3f8] sm:$0xff] %v1029_v11 }
 0x166   : > { %1425 = shalt.err (!%p1422_p5)
}
 0x167   : > { %s1426_s24 = scalar_lea.hbm %s2023_s15, 16384  ;;  %s1430_s27 = scalar_lea.hbm %s2080_s2, 32768 }
 0x168   : > { %p1427_p6 = scmp.ne.s32.totalorder %s2023_s15, %s1426_s24  ;;  %p1431_p10 = scmp.lt.s32.totalorder %s2023_s15, %s2080_s2 }
 0x169   : > { %p1432_p11 = scmp.lt.s32.totalorder %s1430_s27, %s1426_s24 }
 0x16a   : > { %p1428_p7 = pnand %p1427_p6, %p1549_p4 }
 0x16b   : > { %p1433_p12 = por %p1432_p11, %p1431_p10 }
 0x16c   : > { %p1429_p9 = pneg %p1428_p7 }
 0x16e   : > { %p1434_p13 = pnand %p1433_p12, %p1429_p9 }
 0x170   : > { %1437 = shalt.err (!%p1434_p13)
}
 0x171   : > { %s1492_s30 = smov 256   ;;  %s1493_s3 = smov 16  }
 0x172   : > { %1354 = dma.vmem_to_hbm [thread:$0]  (%p1549_p4), %s2025_s6, 16384, %s2023_s15, %s2033_s12, %s1492_s30, %s1492_s30, %s1493_s3  }
 0x173 PF: > { %p1360_p0 = scmp.ge.s32.totalorder %s1488_s14, 2  ;;  %s1190_s4 = sand.u32 1, %s1468_s9  }
 0x174   : > { %s1191_s5 = scalar_lea.sflag [#allocation3], %s1190_s4 }
 0x175   : > { %p1357_p1 = pnand %p1360_p0, %p1556_p8 }
 0x177   : > { %p1358_p2 = pneg %p1357_p1 }
 0x179   : > { %1463 = dma.done.wait (%p1358_p2), %s1191_s5, 16384  }
 0x17a   : > { %1465 = vsyncadd (%p1358_p2), %s1191_s5, 4294950912  ;;  %s15_s14 = sadd.s32 1, %s1488_s14   ;;  %s2083_s9 = smov %s1472_s10 }
 0x17b   : > { %p12_p3 = scmp.ge.s32.totalorder %s15_s14, 4   ;;  %s2084_s10 = smov %s1476_s11 }
 0x17c   : > { %s2085_s11 = smov %s1562_s22  ;;  %s2086_s12 = smov %s1484_s13 }
 0x17d   : > { %s2087_s13 = smov %s2089_s17  ;;  %14 = sbr.rel (!%p12_p3) target bundleno = 4 (0x4), region = 66 }
 0x182   :  { %1196 = vsyncpa [#allocation3], 1 }
 0x183   :  { %1198 = vsyncpa [#allocation3 + $0x1], 1 }

</bundles_post_ra>
